<compile_context>
chip_gen: v5e
topology: v5e:2x2
jax: 0.10.0
libtpu: 0.0.40
codegen_flags: <defaults>
</compile_context>

<pallas_src>
import numpy as np
import jax
import jax.numpy as jnp
from jax.experimental import pallas as pl
from jax.experimental.pallas import tpu as pltpu


def get_dct_matrix(m, n):
    """Deterministic DCT-II basis, identical to the PyTorch get_dctMatrix."""
    N = n
    C = np.zeros([m, n], dtype=np.float64)
    C[0, :] = 1.0 * np.sqrt(1.0 / N)
    for i in range(1, m):
        for j in range(n):
            C[i, j] = np.cos(np.pi * i * (2 * j + 1) / (2 * N)) * np.sqrt(2.0 / N)
    return jnp.asarray(C, dtype=jnp.float32)


_KRON_MAX_HW = 1024  # use the fused kron-matmul path when H*W <= this


def _vmem_capacity_bytes():
    try:
        return int(pltpu.get_tpu_info().vmem_capacity_bytes)
    except Exception:
        return 64 << 20  # conservative: v7x per-TC VMEM


def _choose_tb(bc, per_slice_bytes, resident_bytes, vmem_cap):
    """Slices per grid step from a per-generation VMEM budget."""
    # Pipelined working-set budget: ~1/4 of physical VMEM, clamped to [16, 48] MiB.
    budget = min(max(vmem_cap // 4, 16 << 20), 48 << 20)
    avail = budget - resident_bytes
    tb = max(1, avail // max(per_slice_bytes, 1))
    tb = min(tb, bc)
    if bc >= 32:
        # Keep >= 4 grid steps so each v7x TensorCore still double-buffers.
        tb = min(tb, pl.cdiv(bc, 4))
    if tb < bc and tb >= 8:
        tb = (tb // 8) * 8  # sublane-aligned block
    return max(1, int(tb))


# ---------------------------------------------------------------------------
# Kernels
# ---------------------------------------------------------------------------
def _idct2x_kron_kernel(x_ref, k_ref, o_ref):
    # x_ref: (tb, HW) flattened slices; k_ref: (HW, HW) = kron(dH, dW), resident.
    # Single lane-dense MXU matmul, f32 accumulation, unmasked 128-lane stores.
    o_ref[...] = jnp.dot(
        x_ref[...], k_ref[...], preferred_element_type=jnp.float32
    ).astype(o_ref.dtype)


def _idct2x_twopass_kernel(x_ref, dw_ref, dh_ref, o_ref):
    # Fallback for large H, W (kron matrix would be too big / compute-bound).
    tb, h, w = x_ref.shape
    # W transform: y[b] = x[b] @ dctMatW   as one (tb*H, W) @ (W, W) matmul.
    y = jnp.dot(
        x_ref[...].reshape(tb * h, w), dw_ref[...],
        preferred_element_type=jnp.float32,
    ).reshape(tb, h, w)
    # H transform: out[b] = dctMatH^T @ y[b]  <=>  out[b]^T = y[b]^T @ dctMatH.
    yt = jnp.swapaxes(y, 1, 2)
    zt = jnp.dot(
        yt.reshape(tb * w, h), dh_ref[...],
        preferred_element_type=jnp.float32,
    ).reshape(tb, w, h)
    o_ref[...] = jnp.swapaxes(zt, 1, 2).astype(o_ref.dtype)
    # TODO(synk): for huge slices with W < 128, a fully lane-dense chunked
    # variant (inner fori_loop over sub-batches) would restore DMA efficiency.


# ---------------------------------------------------------------------------
# Wrapper
# ---------------------------------------------------------------------------
def idct2x(x, dct_mat_h, dct_mat_w, kron_mat=None, *, use_bf16=False):
    """2-D inverse DCT over the last two axes of x (any leading batch dims)."""
    *lead, h, w = x.shape
    assert dct_mat_h.shape == (h, h), "dctMatH must be (H, H)"
    assert dct_mat_w.shape == (w, w), "dctMatW must be (W, W)"

    bc = int(np.prod(lead)) if lead else 1
    out_dtype = x.dtype
    io_dtype = jnp.bfloat16 if use_bf16 else x.dtype
    itemsize = np.dtype(io_dtype).itemsize
    vmem_cap = _vmem_capacity_bytes()
    vmem_limit = min(vmem_cap * 3 // 4, 96 << 20)
    hw = h * w

    if hw <= _KRON_MAX_HW:
        # ---- Fused single-matmul path: y_flat = x_flat @ kron(dH, dW) --------
        if kron_mat is None:
            kron_mat = jnp.kron(dct_mat_h, dct_mat_w)
        k_mat = kron_mat.astype(io_dtype)
        x2 = x.reshape(bc, hw).astype(io_dtype)

        resident = 2 * hw * hw * itemsize                 # K (double-buffered)
        per_slice = 2 * 2 * hw * itemsize                 # in + out, 2-buffered
        tb = _choose_tb(bc, per_slice, resident, vmem_cap)
        grid = pl.cdiv(bc, tb)

        flops = 2 * bc * hw * hw
        bytes_accessed = 2 * bc * hw * itemsize + hw * hw * itemsize

        out = pl.pallas_call(
            _idct2x_kron_kernel,
            out_shape=jax.ShapeDtypeStruct((bc, hw), io_dtype),
            grid_spec=pltpu.PrefetchScalarGridSpec(
                num_scalar_prefetch=0,
                grid=(grid,),
                in_specs=[
                    pl.BlockSpec((tb, hw), lambda i: (i, 0)),   # slice block
                    pl.BlockSpec((hw, hw), lambda i: (0, 0)),   # kron, resident
                ],
                out_specs=pl.BlockSpec((tb, hw), lambda i: (i, 0)),
            ),
            compiler_params=pltpu.CompilerParams(
                dimension_semantics=("parallel",),
                vmem_limit_bytes=vmem_limit,
            ),
            cost_estimate=pl.CostEstimate(
                flops=flops, bytes_accessed=bytes_accessed, transcendentals=0,
            ),
        )(x2, k_mat)
        return out.reshape(*lead, h, w).astype(out_dtype)

    # ---- Two-pass fallback for large slices ----------------------------------
    x3 = x.reshape(bc, h, w).astype(io_dtype)
    dw = dct_mat_w.astype(io_dtype)
    dh = dct_mat_h.astype(io_dtype)

    sub = 16 if itemsize == 2 else 8
    h_pad = pl.cdiv(h, sub) * sub
    w_pad = pl.cdiv(w, 128) * 128
    # Account for lane/sublane padding and the y/yt/zt full-block f32 temps.
    per_slice = 2 * 2 * h_pad * w_pad * itemsize + 3 * h_pad * w_pad * 4
    resident = 2 * (h * h + w * w) * itemsize
    tb = _choose_tb(bc, per_slice, resident, vmem_cap)
    grid = pl.cdiv(bc, tb)

    flops = 2 * bc * h * w * (h + w)
    bytes_accessed = 2 * bc * h * w * itemsize + (h * h + w * w) * itemsize

    out = pl.pallas_call(
        _idct2x_twopass_kernel,
        out_shape=jax.ShapeDtypeStruct((bc, h, w), io_dtype),
        grid_spec=pltpu.PrefetchScalarGridSpec(
            num_scalar_prefetch=0,
            grid=(grid,),
            in_specs=[
                pl.BlockSpec((tb, h, w), lambda i: (i, 0, 0)),  # slice block
                pl.BlockSpec((w, w), lambda i: (0, 0)),         # dctMatW, resident
                pl.BlockSpec((h, h), lambda i: (0, 0)),         # dctMatH, resident
            ],
            out_specs=pl.BlockSpec((tb, h, w), lambda i: (i, 0, 0)),
        ),
        compiler_params=pltpu.CompilerParams(
            dimension_semantics=("parallel",),
            vmem_limit_bytes=vmem_limit,
        ),
        cost_estimate=pl.CostEstimate(
            flops=flops, bytes_accessed=bytes_accessed, transcendentals=0,
        ),
    )(x3, dw, dh)
    return out.reshape(*lead, h, w).astype(out_dtype)


class IDCT2x:
    """JAX/Pallas port of the PyTorch IDCT2x module (norm='ortho')."""

    def __init__(self, norm="ortho", use_bf16=False):
        self.norm = norm
        self.use_bf16 = use_bf16
        self.dct_mat_h = None
        self.dct_mat_w = None
        self._kron = None
        self._kron_shape = None

    def check_dct_matrix(self, h, w):
        rebuilt = False
        if self.dct_mat_h is None or self.dct_mat_h.shape[-1] != h:
            self.dct_mat_h = get_dct_matrix(h, h)
            rebuilt = True
        if self.dct_mat_w is None or self.dct_mat_w.shape[-1] != w:
            self.dct_mat_w = get_dct_matrix(w, w)
            rebuilt = True
        if h * w <= _KRON_MAX_HW:
            if rebuilt or self._kron is None or self._kron_shape != (h, w):
                self._kron = jnp.kron(self.dct_mat_h, self.dct_mat_w)
                self._kron_shape = (h, w)
        else:
            self._kron = None
            self._kron_shape = None

    def __call__(self, x):
        h, w = x.shape[-2], x.shape[-1]
        self.check_dct_matrix(h, w)
        return idct2x(x, self.dct_mat_h, self.dct_mat_w, kron_mat=self._kron,
                      use_bf16=self.use_bf16)


if __name__ == "__main__":
    B, C, H, W = 2, 4, 16, 16
    x = jax.random.normal(jax.random.PRNGKey(0), (B, C, H, W), dtype=jnp.float32)

    module = IDCT2x()
    y = jax.block_until_ready(module(x))

    # Reference: same op structure as the PyTorch module, in plain JAX.
    dH, dW = module.dct_mat_h, module.dct_mat_w
    t = x @ dW                               # idct1d along W
    t = jnp.swapaxes(t, -1, -2) @ dH         # idct1d along H (via transpose)
    y_ref = jnp.swapaxes(t, -1, -2)

    np.testing.assert_allclose(np.asarray(y), np.asarray(y_ref), rtol=1e-4, atol=1e-4)
    assert y.shape == x.shape and y.dtype == x.dtype

    print("KERNEL_OK")
</pallas_src>

<mosaic_0001>
module attributes {stable_mosaic.version = 11 : i64} {
  func.func @_idct2x_kron_kernel(%arg0: i32, %arg1: memref<8x256xf32, #tpu.memory_space<vmem>>, %arg2: memref<256x256xf32, #tpu.memory_space<vmem>>, %arg3: memref<8x256xf32, #tpu.memory_space<vmem>>) attributes {dimension_semantics = [#tpu.dimension_semantics<parallel>], iteration_bounds = array<i64: 1>, scalar_prefetch = 0 : i64, scratch_operands = 0 : i64, tpu.core_type = #tpu.core_type<tc>, window_params = [{transform_indices = @transform_0, window_bounds = array<i64: 8, 256>}, {pipeline_mode = #tpu.pipeline_mode<synchronous>, transform_indices = @transform_1, window_bounds = array<i64: 256, 256>}, {transform_indices = @transform_2, window_bounds = array<i64: 8, 256>}]} {
    %c0 = arith.constant 0 : index
    %c0_0 = arith.constant 0 : index
    %0 = vector.load %arg1[%c0, %c0_0] : memref<8x256xf32, #tpu.memory_space<vmem>>, vector<8x256xf32>
    %c0_1 = arith.constant 0 : index
    %c0_2 = arith.constant 0 : index
    %1 = vector.load %arg2[%c0_1, %c0_2] : memref<256x256xf32, #tpu.memory_space<vmem>>, vector<256x256xf32>
    %cst = arith.constant dense<0.000000e+00> : vector<8x256xf32>
    %2 = tpu.matmul %0, %1, %cst {dimension_numbers = #tpu.dot_dimension_numbers<[1], [0], [0], [1], [0, 0, 1, 1], [], []>} : vector<8x256xf32>, vector<256x256xf32>, vector<8x256xf32> -> vector<8x256xf32>
    %c0_3 = arith.constant 0 : index
    %c0_4 = arith.constant 0 : index
    %3 = vector.load %arg3[%c0_3, %c0_4] : memref<8x256xf32, #tpu.memory_space<vmem>>, vector<8x256xf32>
    tpu.vector_store %arg3[%c0_3, %c0_4], %2 {strides = array<i32>} : memref<8x256xf32, #tpu.memory_space<vmem>>, vector<8x256xf32>,
    return
  }
  func.func @transform_0(%arg0: i32) -> (i32, i32) {
    %c0_i32 = arith.constant 0 : i32
    %c0_i32_0 = arith.constant 0 : i32
    return %arg0, %c0_i32 : i32, i32
  }
  func.func @transform_1(%arg0: i32) -> (i32, i32) {
    %c0_i32 = arith.constant 0 : i32
    %c0_i32_0 = arith.constant 0 : i32
    %c0_i32_1 = arith.constant 0 : i32
    return %c0_i32, %c0_i32_0 : i32, i32
  }
  func.func @transform_2(%arg0: i32) -> (i32, i32) {
    %c0_i32 = arith.constant 0 : i32
    %c0_i32_0 = arith.constant 0 : i32
    return %arg0, %c0_i32 : i32, i32
  }
}

</mosaic_0001>

<bundles_post_ra>
// kernel: tpu_custom_call.1
= control target key start
LH: loop header
LB: loop body
LE: loop exit
PB: predicated region body
PF: predicated region fallthrough
CT: control target
= control target key end

     0   :  { %7 = vsyncpa [#allocation3], 0  ;;  %s320_s0 = inlined_call_operand.hbm [shape: f32[8,256], index: 0, kind: input, shape index: {}]   ;;  %s321_s1 = inlined_call_operand.hbm [shape: f32[256,256], index: 1, kind: input, shape index: {}]   ;;  %s322_s2 = inlined_call_operand.hbm [shape: f32[8,256], index: 2, kind: output, shape index: {}]  }
   0x1   :  { %8 = vsyncpa [#allocation6], 0 }
   0x2   :  { %9 = vsyncpa [#allocation4], 0  ;;  %s15_s11 = sshll.u32 %s320_s0, 4  ;;  %s291_s12 = smov [#allocation2]   ;;  %s16_s11 = int_to_ptr.hbm [resolvable:$true] %s15_s11 }
   0x3   :  { %s17_s13 = sshll.u32 %s291_s12, 4  ;;  %s25_s16 = sshll.u32 %s321_s1, 4  ;;  %s18_s13 = int_to_ptr.vmem [resolvable:$true] %s17_s13  ;;  %s26_s16 = int_to_ptr.hbm [resolvable:$true] %s25_s16 }
   0x4   :  { %20 = dma.hbm_to_vmem [thread:$0]  %s16_s11, 256, %s18_s13, [#allocation3]  }
   0x5   :  { %s292_s17 = smov [#allocation5]   ;;  %s293_s19 = smov 256  }
   0x6   :  { %s27_s18 = sshll.u32 %s292_s17, 4  ;;  %s294_s20 = smov 16   ;;  %s28_s18 = int_to_ptr.vmem [resolvable:$true] %s27_s18 }
   0x7   :  { %33 = dma.hbm_to_vmem [thread:$0]  %s26_s16, 8192, %s28_s18, [#allocation6], %s293_s19, %s293_s19, %s294_s20  }
   0x8   :  { %285 = dma.done.wait [#allocation3], 256  }
   0x9   :  { %286 = vsyncadd [#allocation3], 4294967040 }
   0xa   :  { %287 = dma.done.wait [#allocation6], 8192  }
   0xb   :  { %288 = vsyncadd [#allocation6], 4294959104  ;;  %v75_v0 = vld [vmem:[#allocation5 + $0xf8] sm:$0xff]  ;;  %v73_v2 = vld [vmem:[#allocation5 + $0xe8] sm:$0xff]  ;;  %s295_s0 = smov [#allocation7]   ;;  %s197_s23 = sshll.u32 %s322_s2, 4  ;;  %s198_s23 = int_to_ptr.hbm [resolvable:$true] %s197_s23 }
   0xc   :  { %v107_v1 = vld [vmem:[#allocation5 + $0x1f8] sm:$0xff]  ;;  %148 = vmatpush.msra.mxu2 %v75_v0  ;;  %v105_v3 = vld [vmem:[#allocation5 + $0x1e8] sm:$0xff]  ;;  %v74_v6 = vld [vmem:[#allocation5 + $0xf0] sm:$0xff]  ;;  %s195_s1 = sshll.u32 %s295_s0, 4  ;;  %s196_s1 = int_to_ptr.vmem [resolvable:$true] %s195_s1 }
   0xd   :  { %168 = vmatpush.msra.mxu3 %v107_v1  ;;  %v71_v4 = vld [vmem:[#allocation5 + $0xd8] sm:$0xff]  ;;  %v106_v7 = vld [vmem:[#allocation5 + $0x1f0] sm:$0xff]  ;;  %v72_v8 = vld [vmem:[#allocation5 + $0xe0] sm:$0xff]  ;;  %108 = vmatpush.msra.mxu0 %v74_v6 }
   0xe   :  { %v103_v5 = vld [vmem:[#allocation5 + $0x1d8] sm:$0xff]  ;;  %149 = vmatpush.msra.mxu2 %v73_v2  ;;  %v104_v9 = vld [vmem:[#allocation5 + $0x1e0] sm:$0xff]  ;;  %128 = vmatpush.msra.mxu1 %v106_v7  ;;  %v69_v10 = vld [vmem:[#allocation5 + $0xc8] sm:$0xff] }
   0xf   :  { %169 = vmatpush.msra.mxu3 %v105_v3  ;;  %v101_v11 = vld [vmem:[#allocation5 + $0x1c8] sm:$0xff]  ;;  %v70_v12 = vld [vmem:[#allocation5 + $0xd0] sm:$0xff]  ;;  %109 = vmatpush.msra.mxu0 %v72_v8  ;;  %v67_v14 = vld [vmem:[#allocation5 + $0xb8] sm:$0xff] }
  0x10   :  { %150 = vmatpush.msra.mxu2 %v71_v4  ;;  %v102_v13 = vld [vmem:[#allocation5 + $0x1d0] sm:$0xff]  ;;  %129 = vmatpush.msra.mxu1 %v104_v9  ;;  %v99_v15 = vld [vmem:[#allocation5 + $0x1b8] sm:$0xff]  ;;  %v68_v16 = vld [vmem:[#allocation5 + $0xc0] sm:$0xff] }
  0x11   :  { %170 = vmatpush.msra.mxu3 %v103_v5  ;;  %v100_v17 = vld [vmem:[#allocation5 + $0x1c0] sm:$0xff]  ;;  %110 = vmatpush.msra.mxu0 %v70_v12  ;;  %v65_v18 = vld [vmem:[#allocation5 + $0xa8] sm:$0xff]  ;;  %v66_v20 = vld [vmem:[#allocation5 + $0xb0] sm:$0xff] }
  0x12   :  { %151 = vmatpush.msra.mxu2 %v69_v10  ;;  %130 = vmatpush.msra.mxu1 %v102_v13  ;;  %v97_v19 = vld [vmem:[#allocation5 + $0x1a8] sm:$0xff]  ;;  %v98_v21 = vld [vmem:[#allocation5 + $0x1b0] sm:$0xff]  ;;  %v63_v22 = vld [vmem:[#allocation5 + $0x98] sm:$0xff] }
  0x13   :  { %171 = vmatpush.msra.mxu3 %v101_v11  ;;  %111 = vmatpush.msra.mxu0 %v68_v16  ;;  %v95_v23 = vld [vmem:[#allocation5 + $0x198] sm:$0xff]  ;;  %v64_v24 = vld [vmem:[#allocation5 + $0xa0] sm:$0xff]  ;;  %v61_v26 = vld [vmem:[#allocation5 + $0x88] sm:$0xff] }
  0x14   :  { %152 = vmatpush.msra.mxu2 %v67_v14  ;;  %131 = vmatpush.msra.mxu1 %v100_v17  ;;  %v96_v25 = vld [vmem:[#allocation5 + $0x1a0] sm:$0xff]  ;;  %v93_v27 = vld [vmem:[#allocation5 + $0x188] sm:$0xff]  ;;  %v62_v28 = vld [vmem:[#allocation5 + $0x90] sm:$0xff] }
  0x15   :  { %172 = vmatpush.msra.mxu3 %v99_v15  ;;  %112 = vmatpush.msra.mxu0 %v66_v20  ;;  %v94_v29 = vld [vmem:[#allocation5 + $0x190] sm:$0xff]  ;;  %v59_v30 = vld [vmem:[#allocation5 + $0x78] sm:$0xff]  ;;  %v60_v32 = vld [vmem:[#allocation5 + $0x80] sm:$0xff] }
  0x16   :  { %153 = vmatpush.msra.mxu2 %v65_v18  ;;  %132 = vmatpush.msra.mxu1 %v98_v21  ;;  %v91_v31 = vld [vmem:[#allocation5 + $0x178] sm:$0xff]  ;;  %v92_v33 = vld [vmem:[#allocation5 + $0x180] sm:$0xff]  ;;  %v57_v34 = vld [vmem:[#allocation5 + $0x68] sm:$0xff] }
  0x17   :  { %173 = vmatpush.msra.mxu3 %v97_v19  ;;  %113 = vmatpush.msra.mxu0 %v64_v24  ;;  %v89_v35 = vld [vmem:[#allocation5 + $0x168] sm:$0xff]  ;;  %v58_v36 = vld [vmem:[#allocation5 + $0x70] sm:$0xff]  ;;  %v55_v38 = vld [vmem:[#allocation5 + $0x58] sm:$0xff] }
  0x18   :  { %154 = vmatpush.msra.mxu2 %v63_v22  ;;  %133 = vmatpush.msra.mxu1 %v96_v25  ;;  %v90_v37 = vld [vmem:[#allocation5 + $0x170] sm:$0xff]  ;;  %v87_v39 = vld [vmem:[#allocation5 + $0x158] sm:$0xff]  ;;  %v56_v40 = vld [vmem:[#allocation5 + $0x60] sm:$0xff] }
  0x19   :  { %174 = vmatpush.msra.mxu3 %v95_v23  ;;  %114 = vmatpush.msra.mxu0 %v62_v28  ;;  %v88_v41 = vld [vmem:[#allocation5 + $0x160] sm:$0xff]  ;;  %v53_v42 = vld [vmem:[#allocation5 + $0x48] sm:$0xff]  ;;  %v54_v44 = vld [vmem:[#allocation5 + $0x50] sm:$0xff] }
  0x1a   :  { %155 = vmatpush.msra.mxu2 %v61_v26  ;;  %134 = vmatpush.msra.mxu1 %v94_v29  ;;  %v85_v43 = vld [vmem:[#allocation5 + $0x148] sm:$0xff]  ;;  %v86_v45 = vld [vmem:[#allocation5 + $0x150] sm:$0xff]  ;;  %v51_v46 = vld [vmem:[#allocation5 + $0x38] sm:$0xff] }
  0x1b   :  { %175 = vmatpush.msra.mxu3 %v93_v27  ;;  %115 = vmatpush.msra.mxu0 %v60_v32  ;;  %v83_v47 = vld [vmem:[#allocation5 + $0x138] sm:$0xff]  ;;  %v52_v48 = vld [vmem:[#allocation5 + $0x40] sm:$0xff]  ;;  %v49_v50 = vld [vmem:[#allocation5 + $0x28] sm:$0xff] }
  0x1c   :  { %156 = vmatpush.msra.mxu2 %v59_v30  ;;  %135 = vmatpush.msra.mxu1 %v92_v33  ;;  %v84_v49 = vld [vmem:[#allocation5 + $0x140] sm:$0xff]  ;;  %v81_v51 = vld [vmem:[#allocation5 + $0x128] sm:$0xff]  ;;  %v50_v52 = vld [vmem:[#allocation5 + $0x30] sm:$0xff] }
  0x1d   :  { %176 = vmatpush.msra.mxu3 %v91_v31  ;;  %116 = vmatpush.msra.mxu0 %v58_v36  ;;  %v82_v53 = vld [vmem:[#allocation5 + $0x130] sm:$0xff]  ;;  %v47_v54 = vld [vmem:[#allocation5 + $0x18] sm:$0xff]  ;;  %v48_v56 = vld [vmem:[#allocation5 + $0x20] sm:$0xff] }
  0x1e   :  { %157 = vmatpush.msra.mxu2 %v57_v34  ;;  %136 = vmatpush.msra.mxu1 %v90_v37  ;;  %v79_v55 = vld [vmem:[#allocation5 + $0x118] sm:$0xff]  ;;  %v80_v57 = vld [vmem:[#allocation5 + $0x120] sm:$0xff]  ;;  %v45_v58 = vld [vmem:[#allocation5 + $0x8] sm:$0xff] }
  0x1f   :  { %177 = vmatpush.msra.mxu3 %v89_v35  ;;  %117 = vmatpush.msra.mxu0 %v56_v40  ;;  %v77_v59 = vld [vmem:[#allocation5 + $0x108] sm:$0xff]  ;;  %v42_v60 = vld [vmem:[#allocation2] sm:$0xff]  ;;  %v43_v61 = vld [vmem:[#allocation2 + $0x8] sm:$0xff] }
  0x20   :  { %158 = vmatpush.msra.mxu2 %v55_v38  ;;  %137 = vmatpush.msra.mxu1 %v88_v41  ;;  %v46_v62 = vld [vmem:[#allocation5 + $0x10] sm:$0xff]  ;;  %v44_v0 = vld [vmem:[#allocation5] sm:$0xff] }
  0x21   :  { %178 = vmatpush.msra.mxu3 %v87_v39  ;;  %118 = vmatpush.msra.mxu0 %v54_v44  ;;  %v78_v63 = vld [vmem:[#allocation5 + $0x110] sm:$0xff]  ;;  %v76_v1 = vld [vmem:[#allocation5 + $0x100] sm:$0xff] }
  0x22   :  { %159 = vmatpush.msra.mxu2 %v53_v42  ;;  %138 = vmatpush.msra.mxu1 %v86_v45 }
  0x23   :  { %179 = vmatpush.msra.mxu3 %v85_v43  ;;  %119 = vmatpush.msra.mxu0 %v52_v48 }
  0x24   :  { %160 = vmatpush.msra.mxu2 %v51_v46  ;;  %139 = vmatpush.msra.mxu1 %v84_v49 }
  0x25   :  { %180 = vmatpush.msra.mxu3 %v83_v47  ;;  %120 = vmatpush.msra.mxu0 %v50_v52 }
  0x26   :  { %161 = vmatpush.msra.mxu2 %v49_v50  ;;  %140 = vmatpush.msra.mxu1 %v82_v53 }
  0x27   :  { %181 = vmatpush.msra.mxu3 %v81_v51  ;;  %121 = vmatpush.msra.mxu0 %v48_v56 }
  0x28   :  { %162 = vmatpush.msra.mxu2 %v47_v54  ;;  %141 = vmatpush.msra.mxu1 %v80_v57 }
  0x29   :  { %182 = vmatpush.msra.mxu3 %v79_v55  ;;  %122 = vmatpush.msra.mxu0 %v46_v62 }
  0x2a   :  { %163 = vmatpush.msra.mxu2 %v45_v58  ;;  %142 = vmatpush.msra.mxu1 %v78_v63 }
  0x2b   :  { %183 = vmatpush.msra.mxu3 %v77_v59  ;;  %164 = vmatmul.f32.vlgmr.msra.gmra.mxu2 %v42_v60 }
  0x2c   :  { %184 = vmatmul.f32.vlgmr.msra.gmra.mxu3 %v43_v61  ;;  %123 = vmatpush.msra.mxu0 %v44_v0 }
  0x2d   :  { %143 = vmatpush.msra.mxu1 %v76_v1  ;;  %124 = vmatmul.f32.vlgmr.msra.gmra.mxu0 %v42_v60 }
  0x2e   :  { %144 = vmatmul.f32.vlgmr.msra.gmra.mxu1 %v43_v61 }
  0xaa   :  { %v125_v2 = vpop.f32.mrf.mxu0 }
  0xab   :  { %v145_v3 = vpop.f32.mrf.mxu1 }
  0xac   :  { %v146_v4 = vadd.f32 %v145_v3, %v125_v2 }
  0xae   :  { %v165_v5 = vpop.f32.mrf.mxu2  ;;  %188 = vst [vmem:[#allocation7] sm:$0xff] %v146_v4 }
  0xaf   :  { %v185_v6 = vpop.f32.mrf.mxu3 }
  0xb0   :  { %v186_v7 = vadd.f32 %v185_v6, %v165_v5 }
  0xb2   :  { %189 = vst [vmem:[#allocation7 + $0x8] sm:$0xff] %v186_v7 }
  0xb3   :  { %200 = dma.vmem_to_hbm [thread:$0]  %s196_s1, 256, %s198_s23, [#allocation4]  }
  0xb4   :  { %289 = dma.done.wait [#allocation4], 256  }
  0xb5   :  { %290 = vsyncadd [#allocation4], 4294967040 }
  0xb6   :  { %205 = vsyncpa [#allocation3], 1 }
  0xb7   :  { %206 = vsyncpa [#allocation6], 1 }
  0xb8   :  { %207 = vsyncpa [#allocation4], 1 }

</bundles_post_ra>
